<compile_context>
chip_gen: v6e
topology: v6e:2x2x1
jax: 0.10.0
libtpu: 0.0.40
codegen_flags: <defaults>
</compile_context>

<pallas_src>
import functools

import jax
import jax.numpy as jnp
from jax.experimental import pallas as pl
from jax.experimental.pallas import tpu as pltpu


_BLOCK_BUDGET_BYTES = 8 << 20   # per streamed input block (double-buffered -> 16 MiB)
_VMEM_LIMIT_BYTES = 48 << 20    # < v7x 64 MiB physical VMEM; >> default scoped limits


def _avg_pool_kernel(x_ref, o_ref, acc_ref, *, inv_t):
    k = pl.program_id(1)

    @pl.when(k == 0)
    def _():
        acc_ref[...] = jnp.zeros_like(acc_ref)

    # Partial sum over this T tile, accumulated in f32 (no full-tile f32 copy).
    acc_ref[...] += jnp.sum(x_ref[...], axis=1, dtype=jnp.float32)

    @pl.when(k == pl.num_programs(1) - 1)
    def _():
        o_ref[...] = (acc_ref[...] * inv_t).astype(o_ref.dtype)


def _max_pool_kernel(x_ref, o_ref, acc_ref):
    k = pl.program_id(1)

    @pl.when(k == 0)
    def _():
        acc_ref[...] = jnp.full_like(acc_ref, -jnp.inf)

    # Reduce in the native dtype; upcast only the (B, td) partial result.
    acc_ref[...] = jnp.maximum(
        acc_ref[...], jnp.max(x_ref[...], axis=1).astype(jnp.float32))

    @pl.when(k == pl.num_programs(1) - 1)
    def _():
        o_ref[...] = acc_ref[...].astype(o_ref.dtype)


def _divisors(n):
    out = set()
    i = 1
    while i * i <= n:
        if n % i == 0:
            out.add(i)
            out.add(n // i)
        i += 1
    return sorted(out)


def _pick_tile(dim, cap, align):
    """Largest divisor of `dim` that is <= cap and a multiple of `align`
    (the full dim itself is always a legal block, alignment-free)."""
    best = None
    for c in _divisors(dim):
        if c > cap:
            continue
        if c % align == 0 or c == dim:
            best = c
    return best


def pooling_layer(x, pool_type="avg", block_budget_bytes=_BLOCK_BUDGET_BYTES):
    """Pallas equivalent of PoolingLayer.forward: pool x over dim=1.

    x: (B, T, D)  ->  (B, D)
    """
    if pool_type not in ("avg", "max"):
        raise ValueError("Unsupported pooling type: {}".format(pool_type))

    def _jnp_fallback(v):
        return jnp.mean(v, axis=1) if pool_type == "avg" else jnp.max(v, axis=1)

    # TODO(synk): only the common (B, T, D) floating-point layout gets the
    # Pallas kernel; other ranks / integer dtypes use the jnp fallback (integer
    # max would round-trip through f32 and lose exactness above 2^24).
    if x.ndim != 3 or not jnp.issubdtype(x.dtype, jnp.floating):
        return _jnp_fallback(x)

    b, t_orig, d = x.shape
    itemsize = jnp.dtype(x.dtype).itemsize

    # ---- feature (lane) tile -------------------------------------------------
    # Prefer full D (one contiguous tt*D DMA per batch slab).  Split in two
    # only when D >= 256 so v7x's second TensorCore gets a "parallel" block;
    # shrink further only if the per-block VMEM budget demands it.
    td = d
    if d >= 256:
        split = _pick_tile(d, d // 2, 128)
        if split is not None:
            td = split
    while td > 128 and b * 8 * td * itemsize > block_budget_bytes:
        smaller = _pick_tile(d, td - 1, 128)
        if smaller is None:
            break
        td = smaller

    # ---- time (reduction) tile -----------------------------------------------
    tt_cap = block_budget_bytes // max(1, b * td * itemsize)
    if tt_cap < 8:
        # Pathologically large B*D: even a minimal 8-row block blows the budget.
        return _jnp_fallback(x)

    t = t_orig
    tt = _pick_tile(t, min(t, tt_cap), 8)
    if tt is None:
        # Awkward T: pad with the reduction identity so tiles stay at a
        # budgeted, sublane-aligned size (avg divides by the *original* T).
        t_aligned = ((t + 7) // 8) * 8
        tt = min(tt_cap - (tt_cap % 8), 512, t_aligned)
        pad = (-t) % tt
        pad_val = 0.0 if pool_type == "avg" else -jnp.inf
        x = jnp.pad(x, ((0, 0), (0, pad), (0, 0)), constant_values=pad_val)
        t = t + pad

    grid = (d // td, t // tt)

    if pool_type == "avg":
        kernel = functools.partial(_avg_pool_kernel, inv_t=1.0 / t_orig)
    else:
        kernel = _max_pool_kernel

    return pl.pallas_call(
        kernel,
        out_shape=jax.ShapeDtypeStruct((b, d), x.dtype),
        grid_spec=pltpu.PrefetchScalarGridSpec(
            num_scalar_prefetch=0,
            grid=grid,
            in_specs=[pl.BlockSpec((b, tt, td), lambda j, k: (0, k, j))],
            out_specs=pl.BlockSpec((b, td), lambda j, k: (0, j)),
            scratch_shapes=[pltpu.VMEM((b, td), jnp.float32)],
        ),
        compiler_params=pltpu.CompilerParams(
            dimension_semantics=("parallel", "arbitrary"),
            vmem_limit_bytes=_VMEM_LIMIT_BYTES),
    )(x)


if __name__ == "__main__":
    key = jax.random.PRNGKey(0)
    k0, k1, k2 = jax.random.split(key, 3)

    # Small shape consistent with the module: batch=2, seq=16, hidden=128.
    B, T, D = 2, 16, 128
    x = jax.random.normal(k0, (B, T, D), dtype=jnp.float32)

    out_avg = jax.block_until_ready(pooling_layer(x, "avg"))
    out_max = jax.block_until_ready(pooling_layer(x, "max"))
    assert out_avg.shape == (B, D) and out_max.shape == (B, D)
    assert jnp.allclose(out_avg, jnp.mean(x, axis=1), atol=1e-5, rtol=1e-5), "avg mismatch"
    assert jnp.allclose(out_max, jnp.max(x, axis=1), atol=1e-5, rtol=1e-5), "max mismatch"

    # Tiny block budget -> multi-step reduction grid (exercises accumulator
    # init/finalize across T tiles).
    x2 = jax.random.normal(k1, (2, 64, 128), dtype=jnp.float32)
    out2 = jax.block_until_ready(pooling_layer(x2, "avg", block_budget_bytes=16 << 10))
    assert jnp.allclose(out2, jnp.mean(x2, axis=1), atol=1e-5, rtol=1e-5), "avg tiled mismatch"

    # Awkward T (no sublane-aligned divisor under the budget) -> padding path.
    x3 = jax.random.normal(k2, (2, 20, 128), dtype=jnp.float32)
    out3 = jax.block_until_ready(pooling_layer(x3, "max", block_budget_bytes=16 << 10))
    assert jnp.allclose(out3, jnp.max(x3, axis=1), atol=1e-5, rtol=1e-5), "max padded mismatch"

    print("KERNEL_OK")
</pallas_src>

<mosaic_0001>
module attributes {stable_mosaic.version = 11 : i64} {
  func.func @_avg_pool_kernel(%arg0: i32, %arg1: i32, %arg2: memref<2x16x128xf32, #tpu.memory_space<vmem>>, %arg3: memref<2x128xf32, #tpu.memory_space<vmem>>, %arg4: memref<2x128xf32, #tpu.memory_space<vmem>>) attributes {dimension_semantics = [#tpu.dimension_semantics<parallel>, #tpu.dimension_semantics<arbitrary>], iteration_bounds = array<i64: 1, 1>, scalar_prefetch = 0 : i64, scratch_operands = 1 : i64, tpu.core_type = #tpu.core_type<tc>, window_params = [{transform_indices = @transform_0, window_bounds = array<i64: 2, 16, 128>}, {transform_indices = @transform_1, window_bounds = array<i64: 2, 128>}]} {
    %c0_i32 = arith.constant 0 : i32
    %0 = arith.cmpi eq, %arg1, %c0_i32 : i32
    %1 = arith.extui %0 : i1 to i32
    %c0_i32_0 = arith.constant 0 : i32
    %2 = arith.cmpi ne, %1, %c0_i32_0 : i32
    scf.if %2 {
      %cst_9 = arith.constant 0.000000e+00 : f32
      %11 = vector.broadcast %cst_9 : f32 to vector<2x128xf32>
      %c0_10 = arith.constant 0 : index
      %c0_11 = arith.constant 0 : index
      %12 = vector.load %arg4[%c0_10, %c0_11] : memref<2x128xf32, #tpu.memory_space<vmem>>, vector<2x128xf32>
      tpu.vector_store %arg4[%c0_10, %c0_11], %11 {strides = array<i32>} : memref<2x128xf32, #tpu.memory_space<vmem>>, vector<2x128xf32>,
    } else {
    }
    %c0 = arith.constant 0 : index
    %c0_1 = arith.constant 0 : index
    %3 = vector.load %arg4[%c0, %c0_1] : memref<2x128xf32, #tpu.memory_space<vmem>>, vector<2x128xf32>
    %c0_2 = arith.constant 0 : index
    %c0_3 = arith.constant 0 : index
    %c0_4 = arith.constant 0 : index
    %4 = vector.load %arg2[%c0_2, %c0_3, %c0_4] : memref<2x16x128xf32, #tpu.memory_space<vmem>>, vector<2x16x128xf32>
    %cst = arith.constant dense<0.000000e+00> : vector<2x128xf32>
    %5 = vector.multi_reduction <add>, %4, %cst [1] : vector<2x16x128xf32> to vector<2x128xf32>
    %6 = arith.addf %3, %5 : vector<2x128xf32>
    %c0_5 = arith.constant 0 : index
    %c0_6 = arith.constant 0 : index
    %7 = vector.load %arg4[%c0_5, %c0_6] : memref<2x128xf32, #tpu.memory_space<vmem>>, vector<2x128xf32>
    tpu.vector_store %arg4[%c0_5, %c0_6], %6 {strides = array<i32>} : memref<2x128xf32, #tpu.memory_space<vmem>>, vector<2x128xf32>,
    %c0_i32_7 = arith.constant 0 : i32
    %8 = arith.cmpi eq, %arg1, %c0_i32_7 : i32
    %9 = arith.extui %8 : i1 to i32
    %c0_i32_8 = arith.constant 0 : i32
    %10 = arith.cmpi ne, %9, %c0_i32_8 : i32
    scf.if %10 {
      %c0_9 = arith.constant 0 : index
      %c0_10 = arith.constant 0 : index
      %11 = vector.load %arg4[%c0_9, %c0_10] : memref<2x128xf32, #tpu.memory_space<vmem>>, vector<2x128xf32>
      %cst_11 = arith.constant 6.250000e-02 : f32
      %12 = vector.broadcast %cst_11 : f32 to vector<2x128xf32>
      %13 = arith.mulf %11, %12 : vector<2x128xf32>
      %c0_12 = arith.constant 0 : index
      %c0_13 = arith.constant 0 : index
      %14 = vector.load %arg3[%c0_12, %c0_13] : memref<2x128xf32, #tpu.memory_space<vmem>>, vector<2x128xf32>
      tpu.vector_store %arg3[%c0_12, %c0_13], %13 {strides = array<i32>} : memref<2x128xf32, #tpu.memory_space<vmem>>, vector<2x128xf32>,
    } else {
    }
    return
  }
  func.func @transform_0(%arg0: i32, %arg1: i32) -> (i32, i32, i32) {
    %c0_i32 = arith.constant 0 : i32
    %c0_i32_0 = arith.constant 0 : i32
    return %c0_i32, %arg1, %arg0 : i32, i32, i32
  }
  func.func @transform_1(%arg0: i32, %arg1: i32) -> (i32, i32) {
    %c0_i32 = arith.constant 0 : i32
    %c0_i32_0 = arith.constant 0 : i32
    return %c0_i32, %arg0 : i32, i32
  }
}

</mosaic_0001>

<bundles_post_ra>
// kernel: tpu_custom_call.1
= control target key start
LH: loop header
LB: loop body
LE: loop exit
PB: predicated region body
PF: predicated region fallthrough
CT: control target
= control target key end

     0   :  { %6 = vsyncpa [#allocation4], 0  ;;  %s145_s0 = inlined_call_operand.hbm [shape: f32[2,16,128], index: 0, kind: input, shape index: {}]   ;;  %s146_s1 = inlined_call_operand.hbm [shape: f32[2,128], index: 1, kind: output, shape index: {}]  }
   0x1   :  { %7 = vsyncpa [#allocation5], 0  ;;  %s124_s6 = smov [#allocation3]  }
   0x2   :  { %s13_s7 = sshll.u32 %s124_s6, 4  ;;  %s14_s7 = int_to_ptr.vmem [resolvable:$true] %s13_s7 }
   0x3   :  { %s88_s8 = scalar_lea.vmem %s14_s7, 512  ;;  %p93_p1 = scmp.lt.s32.totalorder %s14_s7, %s14_s7 }
   0x4   :  { %p89_p0 = scmp.ne.s32.totalorder %s14_s7, %s88_s8  ;;  %p94_p2 = scmp.lt.s32.totalorder %s88_s8, %s88_s8 }
   0x6   :  { %p95_p3 = por %p94_p2, %p93_p1 }
   0x8   :  { %p96_p4 = pnand %p95_p3, %p89_p0 }
   0xa   :  { %99 = shalt.err (!%p96_p4)
}
   0xb   :  { %s125_s9 = smov 128   ;;  %s126_s10 = smov 8  }
   0xc   :  { %19 = dma.hbm_to_vmem [thread:$0]  %s145_s0, 512, %s14_s7, [#allocation4], %s125_s9, %s125_s9, %s126_s10  }
   0xd   :  { %120 = dma.done.wait [#allocation4], 512  }
   0xe   :  { %121 = vsyncadd [#allocation4], 4294966784  ;;  %v127_v0 = vmov 0.0   ;;  %v29_v1 = vld [vmem:[#allocation3] sm:$0xff]  ;;  %v30_v2 = vld [vmem:[#allocation3 + $0x8] sm:$0xff]  ;;  %vm49_vm0 = vcmask 1041409  }
   0xf   :  { %27 = vst [vmem:[#allocation2] sm:$0x3] %v127_v0  ;;  %v31_v3 = vld [vmem:[#allocation3 + $0x10] sm:$0xff]  ;;  %v32_v4 = vld [vmem:[#allocation3 + $0x18] sm:$0xff]  ;;  %v33_v5 = vadd.f32 %v30_v2, %v29_v1  ;;  %s128_s0 = smov [#allocation6]  }
  0x10   :  { %v40_v6 = vadd.f32 %v32_v4, %v31_v3  ;;  %s66_s13 = sshll.u32 %s128_s0, 4  ;;  %s67_s13 = int_to_ptr.vmem [resolvable:$true] %s66_s13 }
  0x11   :  { %v34_v7 = vrot.slane %v33_v5, 4  ;;  %s100_s14 = scalar_lea.vmem %s67_s13, 32  ;;  %p105_p6 = scmp.lt.s32.totalorder %s67_s13, %s67_s13 }
  0x12   :  { %v41_v8 = vrot.slane %v40_v6, 4  ;;  %p101_p5 = scmp.ne.s32.totalorder %s67_s13, %s100_s14  ;;  %p106_p7 = scmp.lt.s32.totalorder %s100_s14, %s100_s14 }
  0x13   :  { %v35_v9 = vadd.f32 %v34_v7, %v33_v5 }
  0x14   :  { %v42_v10 = vadd.f32 %v41_v8, %v40_v6  ;;  %p107_p8 = por %p106_p7, %p105_p6 }
  0x15   :  { %v36_v11 = vrot.slane %v35_v9, 2 }
  0x16   :  { %v43_v12 = vrot.slane %v42_v10, 2  ;;  %v28_v18 = vld [vmem:[#allocation2] sm:$0x3]  ;;  %p108_p9 = pnand %p107_p8, %p101_p5 }
  0x17   :  { %v37_v13 = vadd.f32 %v36_v11, %v35_v9 }
  0x18   :  { %v44_v14 = vadd.f32 %v43_v12, %v42_v10 }
  0x19   :  { %v38_v15 = vrot.slane %v37_v13, 1 }
  0x1a   :  { %v45_v16 = vrot.slane %v44_v14, 1 }
  0x1b   :  { %v39_v17 = vadd.f32 %v38_v15, %v37_v13 }
  0x1c   :  { %v46_v19 = vadd.f32 %v45_v16, %v44_v14 }
  0x1e   :  { %v50_v20 = vsel %vm49_vm0, %v46_v19, %v39_v17 }
  0x1f   :  { %v52_v21 = vadd.f32 %v50_v20, %v28_v18 }
  0x21   :  { %53 = vst [vmem:[#allocation2] sm:$0x3] %v52_v21 }
  0x28   :  { %v57_v22 = vld [vmem:[#allocation2] sm:$0x3] }
  0x29   :  { %v58_v23 = vmul.f32 0.0625, %v57_v22 }
  0x2b   :  { %59 = vst [vmem:[#allocation6] sm:$0x3] %v58_v23 }
  0x2c   :  { %111 = shalt.err (!%p108_p9)
}
  0x2d   :  { %69 = dma.vmem_to_hbm [thread:$0]  %s67_s13, 32, %s146_s1, [#allocation5]  }
  0x2e   :  { %122 = dma.done.wait [#allocation5], 32  }
  0x2f   :  { %123 = vsyncadd [#allocation5], 4294967264 }
  0x30   :  { %73 = vsyncpa [#allocation4], 1 }
  0x31   :  { %74 = vsyncpa [#allocation5], 1 }

</bundles_post_ra>
